<compile_context>
chip_gen: v7x
topology: tpu7x:2x2x1
jax: 0.10.0
libtpu: 0.0.40
codegen_flags: <defaults>
</compile_context>

<pallas_src>
import functools
from typing import NamedTuple

import jax
import jax.numpy as jnp
from jax.experimental import pallas as pl
from jax.experimental.pallas import tpu as pltpu


def _round_up(x, m):
    return (x + m - 1) // m * m


def _vmem_capacity_bytes():
    try:
        return int(pltpu.get_tpu_info().vmem_capacity_bytes)
    except Exception:
        return 64 << 20  # conservative (v7x per-TC)


class Gemma3MLPWeights(NamedTuple):
    wgu: jax.Array   # (H, 2 * I_pad), per-tile fused [gate_k | up_k] layout
    wd: jax.Array    # (I_pad, H)
    H: int
    I: int
    I_pad: int
    ti: int


def prepare_gemma3_mlp_weights(w_gate, w_up, w_down, *, ti=None,
                               compute_dtype=jnp.bfloat16):
    """One-time weight prep: cast, pad the intermediate dim, fuse gate/up per tile.

    w_gate, w_up : [H, I]   (already laid out for x @ W)
    w_down       : [I, H]
    ti           : intermediate tile width (multiple of 128; default 512 on
                   128-MiB-VMEM parts, 256 on v7x).
    """
    H, I = w_gate.shape
    assert w_up.shape == (H, I) and w_down.shape == (I, H)

    if ti is None:
        ti = 512 if _vmem_capacity_bytes() >= (96 << 20) else 256

    if I <= ti:
        ti_eff = I
    else:
        ti_eff = max(128, (int(ti) // 128) * 128)
        if ti_eff >= 256:                       # 256-wide MXU alignment on v6e/v7x
            ti_eff = (ti_eff // 256) * 256
    I_pad = _round_up(I, ti_eff)

    wg = w_gate.astype(compute_dtype)
    wu = w_up.astype(compute_dtype)
    wd = w_down.astype(compute_dtype)
    if I_pad != I:
        # Zero gate/up columns -> gelu(0)*0 = 0, and zero down rows contribute
        # nothing, so padding the intermediate dimension is exact.
        wg = jnp.pad(wg, ((0, 0), (0, I_pad - I)))
        wu = jnp.pad(wu, ((0, 0), (0, I_pad - I)))
        wd = jnp.pad(wd, ((0, I_pad - I), (0, 0)))

    nk = I_pad // ti_eff
    # Interleave per tile: block k columns = [gate tile k | up tile k].
    wgu = jnp.concatenate(
        [wg.reshape(H, nk, ti_eff), wu.reshape(H, nk, ti_eff)], axis=2
    ).reshape(H, nk * 2 * ti_eff)

    return Gemma3MLPWeights(wgu=wgu, wd=wd, H=H, I=I, I_pad=I_pad, ti=ti_eff)


def _gemma3_mlp_kernel(x_ref, wgu_ref, wd_ref, o_ref, acc_ref, *, ti):
    # x_ref:   (tm, H)        token tile (compute dtype, e.g. bf16)
    # wgu_ref: (H, 2*ti)      fused [gate | up] projection slab for tile k
    # wd_ref:  (ti, H)        down projection slab for tile k
    # o_ref:   (tm, H)
    # acc_ref: (tm, H)        f32 accumulator scratch
    k = pl.program_id(1)

    x = x_ref[...]

    # Single fused gate+up matmul on the MXU, f32 accumulation.
    gu = jnp.dot(x, wgu_ref[...], preferred_element_type=jnp.float32)  # (tm, 2*ti)
    gate = gu[:, :ti]
    up = gu[:, ti:]

    # torch.nn.functional.gelu(..., approximate='tanh') in f32 (tanh -> EUP).
    c = jnp.float32(0.7978845608028654)  # sqrt(2/pi)
    gate_act = 0.5 * gate * (1.0 + jnp.tanh(c * (gate + 0.044715 * gate * gate * gate)))

    # Match PyTorch: activation product in the model compute dtype before down_proj.
    h = (gate_act * up).astype(wd_ref.dtype)

    partial = jnp.dot(h, wd_ref[...], preferred_element_type=jnp.float32)

    @pl.when(k == 0)
    def _():
        acc_ref[...] = partial          # no zero-fill + RMW on the first step

    @pl.when(k > 0)
    def _():
        acc_ref[...] += partial

    @pl.when(k == pl.num_programs(1) - 1)
    def _():
        o_ref[...] = acc_ref[...].astype(o_ref.dtype)


def gemma3_mlp(hidden_states, prep: Gemma3MLPWeights, *, tm=None,
               vmem_limit_bytes=None):
    """Gemma3 MLP forward.

    hidden_states: [T, H]
    prep         : output of prepare_gemma3_mlp_weights (call once at load time)
    returns      : [T, H] in hidden_states.dtype
    """
    T, H = hidden_states.shape
    assert H == prep.H, (H, prep.H)

    out_dtype = hidden_states.dtype
    compute_dtype = prep.wgu.dtype
    cb = jnp.dtype(compute_dtype).itemsize
    ob = jnp.dtype(out_dtype).itemsize
    ti = prep.ti
    I_pad = prep.I_pad

    # ---- generation-aware VMEM budget --------------------------------------------
    vmem_cap = _vmem_capacity_bytes()
    budget = int(vmem_cap * 0.85)          # never request above physical (v7x = 64 MiB)

    # ---- token tile selection ------------------------------------------------------
    if tm is None:
        # Weight-stream intensity ~ tm flops/byte: 768 reaches the v6e compute
        # roofline; 512 is enough on v7x (and must fit its 64 MiB VMEM).
        tm = 768 if vmem_cap >= (96 << 20) else 512
    tm_eff = int(min(tm, _round_up(T, 16)))
    tm_eff = max(16, (tm_eff // 16) * 16)  # bf16 sublane packing (16 rows / vreg)

    def _need(tm_):
        return (2 * tm_ * H * cb            # x tile (double buffered)
                + 2 * (2 * ti) * H * cb     # fused gate+up slab (double buffered)
                + 2 * ti * H * cb           # down slab (double buffered)
                + tm_ * H * 4               # f32 accumulator scratch
                + 2 * tm_ * H * ob)         # output tile (double buffered)

    while _need(tm_eff) > budget and tm_eff > 64:
        tm_eff = max(64, ((tm_eff // 2) // 16) * 16)

    T_pad = _round_up(T, tm_eff)

    if vmem_limit_bytes is None:
        vmem_limit_bytes = min(max(2 * _need(tm_eff) + (8 << 20), 32 << 20), budget)

    # ---- activations: cast / pad (cheap compared to the streamed weights) ----------
    x = hidden_states.astype(compute_dtype)
    if T_pad != T:
        x = jnp.pad(x, ((0, T_pad - T), (0, 0)))

    grid = (T_pad // tm_eff, I_pad // ti)

    cost = pl.CostEstimate(
        flops=6 * T_pad * H * I_pad,
        transcendentals=T_pad * I_pad,
        bytes_accessed=grid[0] * 3 * H * I_pad * cb + T_pad * H * (cb + ob),
    )

    out = pl.pallas_call(
        functools.partial(_gemma3_mlp_kernel, ti=ti),
        out_shape=jax.ShapeDtypeStruct((T_pad, H), out_dtype),
        grid_spec=pltpu.PrefetchScalarGridSpec(
            num_scalar_prefetch=0,
            grid=grid,
            in_specs=[
                pl.BlockSpec((tm_eff, H), lambda i, k: (i, 0)),      # tokens
                pl.BlockSpec((H, 2 * ti), lambda i, k: (0, k)),      # fused gate|up
                pl.BlockSpec((ti, H), lambda i, k: (k, 0)),          # down weights
            ],
            out_specs=pl.BlockSpec((tm_eff, H), lambda i, k: (i, 0)),
            scratch_shapes=[pltpu.VMEM((tm_eff, H), jnp.float32)],
        ),
        compiler_params=pltpu.CompilerParams(
            dimension_semantics=("parallel", "arbitrary"),
            vmem_limit_bytes=int(vmem_limit_bytes),
        ),
        cost_estimate=cost,
    )(x, prep.wgu, prep.wd)

    if T_pad != T:
        out = out[:T]
    return out


def gemma3_mlp_ref(hidden_states, w_gate, w_up, w_down, compute_dtype=jnp.bfloat16):
    """Pure-JAX reference mimicking the kernel's bf16-in / f32-accumulate path."""
    x = hidden_states.astype(compute_dtype).astype(jnp.float32)
    wg = w_gate.astype(compute_dtype).astype(jnp.float32)
    wu = w_up.astype(compute_dtype).astype(jnp.float32)
    wd = w_down.astype(compute_dtype).astype(jnp.float32)
    gate = x @ wg
    up = x @ wu
    c = 0.7978845608028654
    gate_act = 0.5 * gate * (1.0 + jnp.tanh(c * (gate + 0.044715 * gate ** 3)))
    h = (gate_act * up).astype(compute_dtype).astype(jnp.float32)
    return (h @ wd).astype(hidden_states.dtype)


if __name__ == "__main__":
    # Small synthetic config that still exercises token padding and I-axis streaming:
    # tokens = 40 (not a multiple of the tile), hidden = 32, intermediate = 256.
    T, H, I = 40, 32, 256

    key = jax.random.PRNGKey(0)
    k_x, k_g, k_u, k_d = jax.random.split(key, 4)

    hidden_states = jax.random.normal(k_x, (T, H), dtype=jnp.float32)
    w_gate = jax.random.normal(k_g, (H, I), dtype=jnp.float32) * 0.05
    w_up = jax.random.normal(k_u, (H, I), dtype=jnp.float32) * 0.05
    w_down = jax.random.normal(k_d, (I, H), dtype=jnp.float32) * 0.05

    ref = gemma3_mlp_ref(hidden_states, w_gate, w_up, w_down)

    # Streamed path: intermediate tile 128 (2 k-steps), token tile 16 (40 -> 48).
    prep_streamed = prepare_gemma3_mlp_weights(w_gate, w_up, w_down, ti=128)
    out_streamed = gemma3_mlp(hidden_states, prep_streamed, tm=16)
    out_streamed = jax.block_until_ready(out_streamed)
    assert out_streamed.shape == (T, H)
    assert jnp.allclose(out_streamed, ref, atol=1e-2, rtol=1e-2), "streamed path mismatch"

    # Default path: whole (small) problem in one k-step, auto token tile.
    prep_default = prepare_gemma3_mlp_weights(w_gate, w_up, w_down)
    out_default = gemma3_mlp(hidden_states, prep_default)
    out_default = jax.block_until_ready(out_default)
    assert out_default.shape == (T, H)
    assert jnp.allclose(out_default, ref, atol=1e-2, rtol=1e-2), "default path mismatch"

    print("KERNEL_OK")
</pallas_src>

<mosaic_0001>
module attributes {stable_mosaic.version = 11 : i64} {
  func.func @_gemma3_mlp_kernel(%arg0: i32, %arg1: i32, %arg2: memref<16x32xbf16, #tpu.memory_space<vmem>>, %arg3: memref<32x256xbf16, #tpu.memory_space<vmem>>, %arg4: memref<128x32xbf16, #tpu.memory_space<vmem>>, %arg5: memref<16x32xf32, #tpu.memory_space<vmem>>, %arg6: memref<16x32xf32, #tpu.memory_space<vmem>>) attributes {dimension_semantics = [#tpu.dimension_semantics<parallel>, #tpu.dimension_semantics<arbitrary>], iteration_bounds = array<i64: 3, 2>, scalar_prefetch = 0 : i64, scratch_operands = 1 : i64, tpu.core_type = #tpu.core_type<tc>, window_params = [{transform_indices = @transform_0, window_bounds = array<i64: 16, 32>}, {transform_indices = @transform_1, window_bounds = array<i64: 32, 256>}, {transform_indices = @transform_2, window_bounds = array<i64: 128, 32>}, {transform_indices = @transform_3, window_bounds = array<i64: 16, 32>}]} {
    %c0 = arith.constant 0 : index
    %c0_0 = arith.constant 0 : index
    %0 = vector.load %arg2[%c0, %c0_0] : memref<16x32xbf16, #tpu.memory_space<vmem>>, vector<16x32xbf16>
    %c0_1 = arith.constant 0 : index
    %c0_2 = arith.constant 0 : index
    %1 = vector.load %arg3[%c0_1, %c0_2] : memref<32x256xbf16, #tpu.memory_space<vmem>>, vector<32x256xbf16>
    %cst = arith.constant dense<0.000000e+00> : vector<16x256xf32>
    %2 = tpu.matmul %0, %1, %cst {dimension_numbers = #tpu.dot_dimension_numbers<[1], [0], [0], [1], [0, 0, 1, 1], [], []>} : vector<16x32xbf16>, vector<32x256xbf16>, vector<16x256xf32> -> vector<16x256xf32>
    %3 = vector.extract_strided_slice %2 {offsets = [0, 0], sizes = [16, 128], strides = [1, 1]} : vector<16x256xf32> to vector<16x128xf32>
    %4 = vector.extract_strided_slice %2 {offsets = [0, 128], sizes = [16, 128], strides = [1, 1]} : vector<16x256xf32> to vector<16x128xf32>
    %cst_3 = arith.constant 5.000000e-01 : f32
    %5 = vector.broadcast %cst_3 : f32 to vector<16x128xf32>
    %6 = arith.mulf %5, %3 : vector<16x128xf32>
    %cst_4 = arith.constant 4.471500e-02 : f32
    %7 = vector.broadcast %cst_4 : f32 to vector<16x128xf32>
    %8 = arith.mulf %7, %3 : vector<16x128xf32>
    %9 = arith.mulf %8, %3 : vector<16x128xf32>
    %10 = arith.mulf %9, %3 : vector<16x128xf32>
    %11 = arith.addf %3, %10 : vector<16x128xf32>
    %cst_5 = arith.constant 0.797884583 : f32
    %12 = vector.broadcast %cst_5 : f32 to vector<16x128xf32>
    %13 = arith.mulf %12, %11 : vector<16x128xf32>
    %14 = math.tanh %13 : vector<16x128xf32>
    %cst_6 = arith.constant 1.000000e+00 : f32
    %15 = vector.broadcast %cst_6 : f32 to vector<16x128xf32>
    %16 = arith.addf %15, %14 : vector<16x128xf32>
    %17 = arith.mulf %6, %16 : vector<16x128xf32>
    %18 = arith.mulf %17, %4 : vector<16x128xf32>
    %19 = arith.truncf %18 : vector<16x128xf32> to vector<16x128xbf16>
    %c0_7 = arith.constant 0 : index
    %c0_8 = arith.constant 0 : index
    %20 = vector.load %arg4[%c0_7, %c0_8] : memref<128x32xbf16, #tpu.memory_space<vmem>>, vector<128x32xbf16>
    %cst_9 = arith.constant dense<0.000000e+00> : vector<16x32xf32>
    %21 = tpu.matmul %19, %20, %cst_9 {dimension_numbers = #tpu.dot_dimension_numbers<[1], [0], [0], [1], [0, 0, 1, 1], [], []>} : vector<16x128xbf16>, vector<128x32xbf16>, vector<16x32xf32> -> vector<16x32xf32>
    %c0_i32 = arith.constant 0 : i32
    %22 = arith.cmpi eq, %arg1, %c0_i32 : i32
    %23 = arith.extui %22 : i1 to i32
    %c0_i32_10 = arith.constant 0 : i32
    %24 = arith.cmpi ne, %23, %c0_i32_10 : i32
    scf.if %24 {
      %c0_14 = arith.constant 0 : index
      %c0_15 = arith.constant 0 : index
      %31 = vector.load %arg6[%c0_14, %c0_15] : memref<16x32xf32, #tpu.memory_space<vmem>>, vector<16x32xf32>
      tpu.vector_store %arg6[%c0_14, %c0_15], %21 {strides = array<i32>} : memref<16x32xf32, #tpu.memory_space<vmem>>, vector<16x32xf32>,
    } else {
    }
    %c0_i32_11 = arith.constant 0 : i32
    %25 = arith.cmpi sgt, %arg1, %c0_i32_11 : i32
    %26 = arith.extui %25 : i1 to i32
    %c0_i32_12 = arith.constant 0 : i32
    %27 = arith.cmpi ne, %26, %c0_i32_12 : i32
    scf.if %27 {
      %c0_14 = arith.constant 0 : index
      %c0_15 = arith.constant 0 : index
      %31 = vector.load %arg6[%c0_14, %c0_15] : memref<16x32xf32, #tpu.memory_space<vmem>>, vector<16x32xf32>
      %32 = arith.addf %31, %21 : vector<16x32xf32>
      %c0_16 = arith.constant 0 : index
      %c0_17 = arith.constant 0 : index
      %33 = vector.load %arg6[%c0_16, %c0_17] : memref<16x32xf32, #tpu.memory_space<vmem>>, vector<16x32xf32>
      tpu.vector_store %arg6[%c0_16, %c0_17], %32 {strides = array<i32>} : memref<16x32xf32, #tpu.memory_space<vmem>>, vector<16x32xf32>,
    } else {
    }
    %c1_i32 = arith.constant 1 : i32
    %28 = arith.cmpi eq, %arg1, %c1_i32 : i32
    %29 = arith.extui %28 : i1 to i32
    %c0_i32_13 = arith.constant 0 : i32
    %30 = arith.cmpi ne, %29, %c0_i32_13 : i32
    scf.if %30 {
      %c0_14 = arith.constant 0 : index
      %c0_15 = arith.constant 0 : index
      %31 = vector.load %arg6[%c0_14, %c0_15] : memref<16x32xf32, #tpu.memory_space<vmem>>, vector<16x32xf32>
      %c0_16 = arith.constant 0 : index
      %c0_17 = arith.constant 0 : index
      %32 = vector.load %arg5[%c0_16, %c0_17] : memref<16x32xf32, #tpu.memory_space<vmem>>, vector<16x32xf32>
      tpu.vector_store %arg5[%c0_16, %c0_17], %31 {strides = array<i32>} : memref<16x32xf32, #tpu.memory_space<vmem>>, vector<16x32xf32>,
    } else {
    }
    return
  }
  func.func @transform_0(%arg0: i32, %arg1: i32) -> (i32, i32) {
    %c0_i32 = arith.constant 0 : i32
    %c0_i32_0 = arith.constant 0 : i32
    return %arg0, %c0_i32 : i32, i32
  }
  func.func @transform_1(%arg0: i32, %arg1: i32) -> (i32, i32) {
    %c0_i32 = arith.constant 0 : i32
    %c0_i32_0 = arith.constant 0 : i32
    return %c0_i32, %arg1 : i32, i32
  }
  func.func @transform_2(%arg0: i32, %arg1: i32) -> (i32, i32) {
    %c0_i32 = arith.constant 0 : i32
    %c0_i32_0 = arith.constant 0 : i32
    return %arg1, %c0_i32 : i32, i32
  }
  func.func @transform_3(%arg0: i32, %arg1: i32) -> (i32, i32) {
    %c0_i32 = arith.constant 0 : i32
    %c0_i32_0 = arith.constant 0 : i32
    return %arg0, %c0_i32 : i32, i32
  }
}

</mosaic_0001>

<bundles_post_ra>
// kernel: tpu_custom_call.1
= control target key start
LH: loop header
LB: loop body
LE: loop exit
PB: predicated region body
PF: predicated region fallthrough
CT: control target
= control target key end

     0   :  { %s824_s12 = smov 0   ;;  %s826_s13 = smov 0   ;;  %s930_s0 = inlined_call_operand.vmem [shape: bf16[48,32], index: 0, kind: input, shape index: {}]   ;;  %s931_s1 = inlined_call_operand.vmem [shape: bf16[32,512], index: 1, kind: input, shape index: {}]   ;;  %s932_s2 = inlined_call_operand.vmem [shape: bf16[256,32], index: 2, kind: input, shape index: {}]   ;;  %s933_s3 = inlined_call_operand.vmem [shape: f32[48,32], index: 3, kind: output, shape index: {}]  }
   0x1   :  { %s828_s14 = smov 0   ;;  %s830_s15 = smov 0  }
   0x2   :  { %s832_s16 = smov 0   ;;  %s834_s17 = smov 0  }
   0x3   :  { %s836_s18 = smov 0  }
   0x4 LB: > { %s22_s19 = sadd.s32 1, %s791_s16  ;;  %s25_s20 = sadd.s32 1, %s795_s17  ;;  %s799_s18 = sphi %s836_s18, %s13_s18   ;;  %s795_s17 = sphi %s834_s17, %s939_s17   ;;  %s791_s16 = sphi %s832_s16, %s938_s16   ;;  %s787_s15 = sphi %s830_s15, %s937_s15   ;;  %s783_s14 = sphi %s828_s14, %s936_s14   ;;  %s779_s13 = sphi %s826_s13, %s935_s13   ;;  %s775_s12 = sphi %s824_s12, %s934_s12  }
   0x5   : > { %p23_p0 = scmp.ge.s32.totalorder %s22_s19, 2  ;;  %s58_s21 = sadd.s32 1, %s779_s13 }
   0x6   : > { %p65_p1 = scmp.ne.s32.totalorder %s779_s13, %s775_s12  ;;  %p66_p2 = scmp.eq.s32.totalorder %s799_s18, 0 }
   0x7   : > { %s941_s19 = smov (%p23_p0, %s22_s19), 0  ;;  %s943_s20 = smov (!%p23_p0, %s25_s20), %s795_s17 }
   0x8   : > { %s55_s22 = ssub.s32 %s791_s16, %s941_s19  ;;  %p67_p3 = por %p66_p2, %p65_p1 }
   0x9   : > { %p27_p4 = scmp.ge.s32.totalorder %s943_s20, 3  ;;  %p56_p5 = scmp.eq.s32.totalorder %s55_s22, 0 }
   0xa   : > { %p606_p6 = scmp.ge.s32.totalorder %s799_s18, 6 }
   0xb   : > { %s945_s20 = smov (%p27_p4, %s943_s20), 0 }
   0xc   : > { %s873_s23 = scalar_select %p56_p5, %s779_s13, %s58_s21  }
   0xd   : > { %143 = sbr.rel (%p606_p6) target bundleno = 27 (0x1b), region = 16 }
  0x14   : > { %155 = sbr.rel (!%p67_p3) target bundleno = 27 (0x1b), region = 24  ;;  %s157_s24 = sand.u32 (%p67_p3), 1, %s779_s13  }
  0x15   : > { %s637_s25 = sshll.u32 (%p67_p3), %s791_s16, 3  ;;  %s607_s26 = sshll.u32 (%p67_p3), %s157_s24, 5 }
  0x16   : > { %s162_s29 = scalar_lea.vmem (%p67_p3), %s931_s1, %s637_s25  ;;  %s159_s30 = scalar_lea.vmem (%p67_p3), [#allocation3], %s607_s26 }
  0x17   : > { %v196_v0 = vld [vmem:[%s162_s29] sm:$0xff] (%p67_p3)  ;;  %v198_v1 = vld [vmem:[%s162_s29 + $0x10] sm:$0xff] (%p67_p3) }
  0x18   : > { %v200_v2 = vld [vmem:[%s162_s29 + $0x20] sm:$0xff] (%p67_p3)  ;;  %197 = vst [vmem:[%s159_s30] sm:$0xff] (%p67_p3), %v196_v0  ;;  %199 = vst [vmem:[%s159_s30 + $0x8] sm:$0xff] (%p67_p3), %v198_v1  ;;  %v202_v3 = vld [vmem:[%s162_s29 + $0x30] sm:$0xff] (%p67_p3) }
  0x19   : > { %201 = vst [vmem:[%s159_s30 + $0x10] sm:$0xff] (%p67_p3), %v200_v2  ;;  %203 = vst [vmem:[%s159_s30 + $0x18] sm:$0xff] (%p67_p3), %v202_v3 }
  0x1b PF: > { %p610_p7 = scmp.ge.s32.totalorder %s799_s18, 1  ;;  %p217_p8 = scmp.lt.s32.totalorder %s799_s18, 7 }
  0x1d   : > { %p218_p9 = pnand %p610_p7, %p217_p8 }
  0x1e   : > { %s224_s4 = sand.u32 (!%p218_p9), 1, %s775_s12   ;;  %s612_s5 = sshll.u32 (!%p218_p9), %s787_s15, 1  ;;  %v801_v4 = vmov (!%p218_p9), 0   ;;  %vm308_vm0 = vcmask (!%p218_p9), 261120   ;;  %v802_v11 = vmov (!%p218_p9), 0.0   ;;  %vm803_vm1 = vmmov (!%p218_p9), 0  }
  0x1f   : > { %221 = sbr.rel (%p218_p9) target bundleno = 519 (0x207), region = 66  ;;  %s611_s6 = sshll.u32 (!%p218_p9), %s224_s4, 5  ;;  %344 = vmatprep.mubr.bf16.mxu0 (!%p218_p9), %v801_v4  ;;  %647 = vmatprep.subr.bf16.mxu1 (!%p218_p9), %v802_v11 }
  0x20   : > { %p258_p10 = scmp.lt.s32.totalorder (!%p218_p9), %s612_s5, 5  ;;  %s226_s7 = scalar_lea.vmem (!%p218_p9), [#allocation3], %s611_s6  ;;  %663 = vmatprep.mubr.msk.bf16.mxu1 (!%p218_p9), %vm803_vm1, %v802_v11 }
  0x21   : > { %v726_v5 = vld [vmem:[%s226_s7 + $0x4] ss:$8 sps:$4 sm:$0xff] (!%p218_p9)   ;;  %v728_v6 = vld [vmem:[%s226_s7] ss:$8 sps:$4 sm:$0xff] (!%p218_p9)   ;;  %v729_v7 = vld [vmem:[%s226_s7 + $0x14] ss:$8 sps:$4 sm:$0xff] (!%p218_p9)  }
  0x22   : > { %312 = vmatprep.subr.bf16.mxu0 (!%p218_p9), %v726_v5  ;;  %v731_v8 = vld [vmem:[%s226_s7 + $0x10] ss:$8 sps:$4 sm:$0xff] (!%p218_p9)   ;;  %s614_s24 = sshll.u32 (!%p218_p9), %s783_s14, 4  ;;  %p632_p12 = scmp.ne.s32.totalorder (!%p218_p9), %s783_s14, 0 }
  0x23   : > { %313 = vmatpush1.bf16.msra.mxu0 (!%p218_p9), %v728_v6  ;;  %p265_p11 = scmp.lt.s32.totalorder (!%p218_p9), %s614_s24, 31 }
  0x24   : > { %314 = vmatprep.subr.bf16.mxu0 (!%p218_p9), %v729_v7 }
  0x26   : > { %s947_s5 = smov (!%p258_p10, %s612_s5), 5  ;;  %s949_s24 = smov (!%p265_p11, %s614_s24), 31 }
  0x27   : > { %s613_s8 = sshll.u32 %s947_s5, 2  ;;  %s617_s9 = sshll.u32 %s947_s5, 3  ;;  %315 = vmatpush1.bf16.msra.mxu0 %v731_v8 }
  0x28   : > { %s261_s12 = scalar_lea.vmem %s930_s0, %s613_s8  ;;  %s891_s22 = scalar_lea.vmem %s933_s3, %s617_s9 }
  0x29   : > { %v732_v9 = vld [vmem:[%s261_s12] sm:$0xff]   ;;  %s615_s25 = sshll.u32 %s949_s24, 2 }
  0x2a   : > { %623 = vmatmul.mubr.msk.bf16.vlgmr.msra.gmra.mrb[0].mxu0 %vm308_vm0, %v732_v9  ;;  %s268_s28 = scalar_lea.vmem %s932_s2, %s615_s25 }
  0x2b   : > { %v733_v10 = vld [vmem:[%s268_s28] sm:$0xff]   ;;  %v734_v12 = vld [vmem:[%s268_s28 + $0x8] sm:$0xff]   ;;  %v735_v13 = vld [vmem:[%s268_s28 + $0x10] sm:$0xff]  }
  0x2c   : > { %648 = vmatpush3.bf16.msra.mxu1 %v733_v10  ;;  %v736_v14 = vld [vmem:[%s268_s28 + $0x18] sm:$0xff]   ;;  %v737_v15 = vld [vmem:[%s268_s28 + $0x20] sm:$0xff]   ;;  %v738_v16 = vld [vmem:[%s268_s28 + $0x28] sm:$0xff]  }
  0x2d   : > { %649 = vmatprep.subr.bf16.mxu1 %v802_v11  ;;  %v739_v17 = vld [vmem:[%s268_s28 + $0x30] sm:$0xff]   ;;  %v740_v18 = vld [vmem:[%s268_s28 + $0x38] sm:$0xff]  }
  0x30   : > { %650 = vmatpush3.bf16.msra.mxu1 %v734_v12 }
  0x31   : > { %651 = vmatprep.subr.bf16.mxu1 %v802_v11 }
  0x34   : > { %652 = vmatpush3.bf16.msra.mxu1 %v735_v13 }
  0x35   : > { %653 = vmatprep.subr.bf16.mxu1 %v802_v11 }
  0x38   : > { %654 = vmatpush3.bf16.msra.mxu1 %v736_v14 }
  0x39   : > { %655 = vmatprep.subr.bf16.mxu1 %v802_v11 }
  0x3c   : > { %656 = vmatpush3.bf16.msra.mxu1 %v737_v15 }
  0x3d   : > { %657 = vmatprep.subr.bf16.mxu1 %v802_v11 }
  0x40   : > { %658 = vmatpush3.bf16.msra.mxu1 %v738_v16 }
  0x41   : > { %659 = vmatprep.subr.bf16.mxu1 %v802_v11 }
  0x44   : > { %660 = vmatpush3.bf16.msra.mxu1 %v739_v17 }
  0x45   : > { %661 = vmatprep.subr.bf16.mxu1 %v802_v11 }
  0x48   : > { %662 = vmatpush3.bf16.msra.mxu1 %v740_v18 }
  0xfd   : > { %v346_v19 = vpop.f32.mrb[0].mxu0 }
  0xfe   : > { %v357_v20 = vmul.f32 0.044715, %v346_v19  ;;  %v348_v21 = vpop.f32.mrb[1].mxu0  ;;  %v355_v34 = vmul.f32 0.5, %v346_v19 }
  0xff   : > { %v350_v22 = vpop.f32.mrb[2].mxu0 }
 0x100   : > { %v359_v23 = vmul.f32 %v357_v20, %v346_v19  ;;  %v358_v24 = vmul.f32 0.044715, %v350_v22  ;;  %v352_v25 = vpop.f32.mrb[3].mxu0  ;;  %v356_v38 = vmul.f32 0.5, %v350_v22 }
 0x102   : > { %v361_v26 = vmul.f32 %v359_v23, %v346_v19  ;;  %v360_v27 = vmul.f32 %v358_v24, %v350_v22 }
 0x104   : > { %v363_v28 = vadd.f32 %v361_v26, %v346_v19  ;;  %v362_v29 = vmul.f32 %v360_v27, %v350_v22 }
 0x106   : > { %v365_v30 = vmul.f32 0.7978846, %v363_v28  ;;  %v364_v31 = vadd.f32 %v362_v29, %v350_v22 }
 0x108   : > { %741 = vtanh.f32 %v365_v30  ;;  %v366_v32 = vmul.f32 0.7978846, %v364_v31 }
 0x10a   : > { %743 = vtanh.f32 %v366_v32 }
 0x112   : > { %v742_v33 = vpop.eup %741 }
 0x113   : > { %v369_v35 = vadd.f32 1.0, %v742_v33 }
 0x114   : > { %v744_v36 = vpop.eup %743 }
 0x115   : > { %v371_v37 = vmul.f32 %v369_v35, %v355_v34  ;;  %v370_v39 = vadd.f32 1.0, %v744_v36 }
 0x117   : > { %v373_v40 = vmul.f32 %v371_v37, %v348_v21  ;;  %v372_v41 = vmul.f32 %v370_v39, %v356_v38 }
 0x119   : > { %v374_v42 = vmul.f32 %v372_v41, %v352_v25 }
 0x11b   : > { %v375_v43 = vpack.c.bf16 %v374_v42, %v373_v40 }
 0x11d   : > { %664 = vmatmul.mubr.bf16.vlgmr.msra.gmra.mrb[0].mxu1 %v375_v43 }
 0x1ed   : > { %484 = sbr.rel (%p632_p12) target bundleno = 500 (0x1f4), region = 74 }
 0x1f0   : > { %v474_v44 = vpop.f32.mrb[0].mxu1 }
 0x1f1   : > { %v665_v45 = vpop.f32.mrb[1].mxu1  ;;  %485 = vst.msk [vmem:[#allocation2] sm:$0xff] (!%p632_p12), %vm308_vm0, %v474_v44 }
 0x1f2   : > { %v477_v46 = vpop.f32.mrb[2].mxu1 }
 0x1f3   : > { %v666_v47 = vpop.f32.mrb[3].mxu1  ;;  %486 = vst.msk [vmem:[#allocation2 + $0x8] sm:$0xff] (!%p632_p12), %vm308_vm0, %v477_v46 }
 0x1f4 PF: > { %p633_p13 = scmp.le.s32.totalorder %s783_s14, 0 }
 0x1f6   : > { %490 = sbr.rel (%p633_p13) target bundleno = 510 (0x1fe), region = 78 }
 0x1f8   : > { %v491_v48 = vld [vmem:[#allocation2] sm:$0xff] (!%p633_p13) }
 0x1f9   : > { %v493_v50 = vadd.f32 (!%p633_p13), %v491_v48, %v474_v44 }
 0x1fa   : > { %v492_v49 = vld [vmem:[#allocation2 + $0x8] sm:$0xff] (!%p633_p13) }
 0x1fb   : > { %v494_v51 = vadd.f32 (!%p633_p13), %v492_v49, %v477_v46  ;;  %495 = vst.msk [vmem:[#allocation2] sm:$0xff] (!%p633_p13), %vm308_vm0, %v493_v50 }
 0x1fd   : > { %496 = vst.msk [vmem:[#allocation2 + $0x8] sm:$0xff] %vm308_vm0, %v494_v51 }
 0x1fe PF: > { %p634_p0 = scmp.ne.s32.totalorder %s783_s14, 1 }
 0x200   : > { %500 = sbr.rel (%p634_p0) target bundleno = 519 (0x207), region = 82 }
 0x203   : > { %v501_v52 = vld [vmem:[#allocation2] sm:$0xff] (!%p634_p0) }
 0x204   : > { %v502_v53 = vld [vmem:[#allocation2 + $0x8] sm:$0xff] (!%p634_p0)  ;;  %503 = vst.msk [vmem:[%s891_s22] sm:$0xff] (!%p634_p0), %vm308_vm0, %v501_v52 }
 0x205   : > { %504 = vst.msk [vmem:[%s891_s22 + $0x8] sm:$0xff] (!%p634_p0), %vm308_vm0, %v502_v53 }
 0x207 PF: > { %s13_s18 = sadd.s32 1, %s799_s18   ;;  %s934_s12 = smov %s779_s13 }
 0x208   : > { %p10_p1 = scmp.ge.s32.totalorder %s13_s18, 8   ;;  %s935_s13 = smov %s873_s23 }
 0x209   : > { %s936_s14 = smov %s791_s16  ;;  %s937_s15 = smov %s795_s17 }
 0x20a   : > { %s938_s16 = smov %s941_s19  ;;  %s939_s17 = smov %s945_s20 }
 0x20b   :  { %12 = sbr.rel (!%p10_p1) target bundleno = 4 (0x4), region = 123 }

</bundles_post_ra>
